<compile_context>
chip_gen: v7x
topology: tpu7x:2x2x1
jax: 0.10.0
libtpu: 0.0.40
codegen_flags: <defaults>
</compile_context>

<pallas_src>
import functools
import math

import jax
import jax.numpy as jnp
from jax import lax
from jax.experimental import pallas as pl
from jax.experimental.pallas import tpu as pltpu


def _encoder_layer_kernel(
    xq_ref,       # [1, tq, D] f32   query-row tile (also the residual)
    xkv_ref,      # [1, S,  D] bf16  full sequence (K/V operand, fetched once per b)
    wqkv_ref,     # [D, H*(2*dk+dv)] bf16   Wq | Wk | Wv  (column-concatenated)
    bqkv_ref,     # [1, H*(2*dk+dv)] f32    bq | bk | bv
    wo_ref,       # [H*dv, D] bf16
    vecs_ref,     # [4, D] f32   rows: bo, gamma, beta, b2
    w1_ref,       # [D, d_ff] bf16
    b1_ref,       # [1, d_ff] f32
    w2_ref,       # [d_ff, D] bf16
    out_ref,      # [1, tq, D] f32
    kv_ref,       # VMEM scratch [S, H*(dk+dv)] bf16   (K | V, all heads)
    ctx_ref,      # VMEM scratch [tq, H*dv] bf16       (per-head contexts)
    *,
    n_heads, d_k, d_v, scale,
):
    qi = pl.program_id(1)
    H, dk, dv = n_heads, d_k, d_v
    hdk = H * dk
    hdv = H * dv
    bf16 = jnp.bfloat16

    # --- K/V projection for the full sequence: once per batch element -------
    @pl.when(qi == 0)
    def _():
        xkv = xkv_ref[0]                                   # [S, D] bf16
        kv = jnp.dot(xkv, wqkv_ref[:, hdk:hdk + hdk + hdv],
                     preferred_element_type=jnp.float32)
        kv = kv + bqkv_ref[:, hdk:hdk + hdk + hdv]         # [S, H*(dk+dv)] f32
        kv_ref[...] = kv.astype(bf16)

    # --- Q projection for this query tile: one fused dot over all heads -----
    x_f32 = xq_ref[0]                                      # [tq, D] f32 (residual)
    x_b = x_f32.astype(bf16)
    q = jnp.dot(x_b, wqkv_ref[:, :hdk],
                preferred_element_type=jnp.float32)
    q = (q + bqkv_ref[:, :hdk]) * scale                    # [tq, H*dk] f32

    # --- scaled dot-product attention, unrolled over heads ------------------
    for h in range(H):
        qh = q[:, h * dk:(h + 1) * dk].astype(bf16)        # [tq, dk]
        kh = kv_ref[:, h * dk:(h + 1) * dk]                # [S, dk] bf16
        vh = kv_ref[:, hdk + h * dv: hdk + (h + 1) * dv]   # [S, dv] bf16
        # contract d_k directly (no explicit transpose).
        s = lax.dot_general(qh, kh,
                            dimension_numbers=(((1,), (1,)), ((), ())),
                            preferred_element_type=jnp.float32)     # [tq, S]
        s = s - jnp.max(s, axis=-1, keepdims=True)
        e = jnp.exp(s)
        attn = e * pl.reciprocal(jnp.sum(e, axis=-1, keepdims=True),
                                 approx=True)                       # softmax
        ctx_h = jnp.dot(attn.astype(bf16), vh,
                        preferred_element_type=jnp.float32)         # [tq, dv]
        ctx_ref[:, h * dv:(h + 1) * dv] = ctx_h.astype(bf16)

    # --- output projection over all heads at once (full H*dv contraction) ---
    bo = vecs_ref[0:1, :]
    gamma = vecs_ref[1:2, :]
    beta = vecs_ref[2:3, :]
    b2 = vecs_ref[3:4, :]

    y = jnp.dot(ctx_ref[...], wo_ref[...],
                preferred_element_type=jnp.float32) + bo + x_f32    # residual

    # --- LayerNorm (eps=1e-5, biased variance) -------------------------------
    mean = jnp.mean(y, axis=-1, keepdims=True)
    var = jnp.mean((y - mean) ** 2, axis=-1, keepdims=True)
    y = (y - mean) * lax.rsqrt(var + 1e-5)
    y = y * gamma + beta

    # --- position-wise FFN with exact erf GELU -------------------------------
    h1 = jnp.dot(y.astype(bf16), w1_ref[...],
                 preferred_element_type=jnp.float32) + b1_ref[...]
    g = h1 * 0.5 * (1.0 + lax.erf(h1 * (1.0 / math.sqrt(2.0))))
    out = jnp.dot(g.astype(bf16), w2_ref[...],
                  preferred_element_type=jnp.float32) + b2
    out_ref[0] = out.astype(out_ref.dtype)


def encoder_layer(x, params, *, n_heads, d_k, d_v, block_q=None,
                  vmem_limit_bytes=48 * 1024 * 1024):
    """x: [B, S, D] float32; params: dict of f32 weights (see _init_params)."""
    B, S, D = x.shape
    d_ff = params["w1"].shape[1]

    if block_q is None:
        block_q = S if S <= 512 else max(t for t in range(1, 513) if S % t == 0)
    assert S % block_q == 0, "block_q must divide S"
    num_q = S // block_q

    bf16 = jnp.bfloat16
    H, dk, dv = n_heads, d_k, d_v
    wqkv_cols = H * (2 * dk + dv)

    # coalesced, resident weights (constant index_maps -> fetched once).
    w_qkv = jnp.concatenate([params["wq"], params["wk"], params["wv"]],
                            axis=1).astype(bf16)            # [D, H*(2dk+dv)]
    b_qkv = jnp.concatenate([params["bq"], params["bk"], params["bv"]],
                            axis=1)                         # [1, H*(2dk+dv)] f32
    wo = params["wo"].astype(bf16)                          # [H*dv, D]
    w1 = params["w1"].astype(bf16)                          # [D, d_ff]
    w2 = params["w2"].astype(bf16)                          # [d_ff, D]
    vecs = jnp.concatenate([params["bo"], params["gamma"],
                            params["beta"], params["b2"]], axis=0)   # [4, D] f32
    b1 = params["b1"]                                       # [1, d_ff] f32
    x_bf16 = x.astype(bf16)                                 # K/V operand, pre-cast

    def const(shape):
        return pl.BlockSpec(shape, lambda b, qi, _s=len(shape): (0,) * _s)

    kernel = functools.partial(
        _encoder_layer_kernel,
        n_heads=n_heads, d_k=d_k, d_v=d_v, scale=1.0 / math.sqrt(d_k))

    # NOTE: with D not a multiple of 128 the final store is a masked vst; at
    # real model sizes (D >= 128) the (block_q, D) output tile is lane-dense.
    return pl.pallas_call(
        kernel,
        out_shape=jax.ShapeDtypeStruct((B, S, D), jnp.float32),
        grid_spec=pltpu.PrefetchScalarGridSpec(
            num_scalar_prefetch=0,
            grid=(B, num_q),
            in_specs=[
                pl.BlockSpec((1, block_q, D), lambda b, qi: (b, qi, 0)),  # x tile
                pl.BlockSpec((1, S, D), lambda b, qi: (b, 0, 0)),         # x full (bf16)
                const((D, wqkv_cols)),        # Wq|Wk|Wv
                const((1, wqkv_cols)),        # bq|bk|bv
                const((H * dv, D)),           # Wo
                const((4, D)),                # bo, gamma, beta, b2
                const((D, d_ff)),             # W1
                const((1, d_ff)),             # b1
                const((d_ff, D)),             # W2
            ],
            out_specs=pl.BlockSpec((1, block_q, D), lambda b, qi: (b, qi, 0)),
            scratch_shapes=[
                pltpu.VMEM((S, H * (dk + dv)), bf16),     # K/V cache (per batch elem)
                pltpu.VMEM((block_q, H * dv), bf16),      # per-head contexts
            ],
        ),
        compiler_params=pltpu.CompilerParams(
            # qi must stay "arbitrary": the K/V scratch is filled at qi==0 and
            # reused for qi>0 within each batch element.
            dimension_semantics=("parallel", "arbitrary"),
            vmem_limit_bytes=vmem_limit_bytes,
        ),
    )(x, x_bf16, w_qkv, b_qkv, wo, vecs, w1, b1, w2)


def _init_params(key, d_model, d_k, d_v, n_heads, d_ff):
    ks = jax.random.split(key, 12)
    s = 0.05
    return {
        "wq": s * jax.random.normal(ks[0], (d_model, d_k * n_heads), jnp.float32),
        "bq": s * jax.random.normal(ks[1], (1, d_k * n_heads), jnp.float32),
        "wk": s * jax.random.normal(ks[2], (d_model, d_k * n_heads), jnp.float32),
        "bk": s * jax.random.normal(ks[3], (1, d_k * n_heads), jnp.float32),
        "wv": s * jax.random.normal(ks[4], (d_model, d_v * n_heads), jnp.float32),
        "bv": s * jax.random.normal(ks[5], (1, d_v * n_heads), jnp.float32),
        "wo": s * jax.random.normal(ks[6], (d_v * n_heads, d_model), jnp.float32),
        "bo": s * jax.random.normal(ks[7], (1, d_model), jnp.float32),
        "gamma": jnp.ones((1, d_model), jnp.float32),
        "beta": jnp.zeros((1, d_model), jnp.float32),
        "w1": s * jax.random.normal(ks[8], (d_model, d_ff), jnp.float32),
        "b1": s * jax.random.normal(ks[9], (1, d_ff), jnp.float32),
        "w2": s * jax.random.normal(ks[10], (d_ff, d_model), jnp.float32),
        "b2": s * jax.random.normal(ks[11], (1, d_model), jnp.float32),
    }


def _reference(x, p, *, n_heads, d_k, d_v):
    """Pure-JAX f32 reference matching the PyTorch forward."""
    B, S, D = x.shape
    q = x @ p["wq"] + p["bq"]
    k = x @ p["wk"] + p["bk"]
    v = x @ p["wv"] + p["bv"]
    q = q.reshape(B, S, n_heads, d_k).transpose(0, 2, 1, 3)
    k = k.reshape(B, S, n_heads, d_k).transpose(0, 2, 1, 3)
    v = v.reshape(B, S, n_heads, d_v).transpose(0, 2, 1, 3)
    scores = jnp.einsum("bhqd,bhkd->bhqk", q, k) / math.sqrt(d_k)
    attn = jax.nn.softmax(scores, axis=-1)
    ctx = jnp.einsum("bhqk,bhkd->bhqd", attn, v)
    ctx = ctx.transpose(0, 2, 1, 3).reshape(B, S, n_heads * d_v)
    out = ctx @ p["wo"] + p["bo"] + x
    mean = out.mean(-1, keepdims=True)
    var = ((out - mean) ** 2).mean(-1, keepdims=True)
    y = (out - mean) / jnp.sqrt(var + 1e-5) * p["gamma"] + p["beta"]
    h1 = y @ p["w1"] + p["b1"]
    g = h1 * 0.5 * (1.0 + jax.lax.erf(h1 / math.sqrt(2.0)))
    return g @ p["w2"] + p["b2"]


if __name__ == "__main__":
    # Small shapes consistent with the module: d_model=32, d_k=d_v=8, n_heads=4, d_ff=64
    B, S, D = 2, 8, 32
    d_k = d_v = 8
    n_heads = 4
    d_ff = 64

    key = jax.random.PRNGKey(0)
    kx, kp = jax.random.split(key)
    x = jax.random.normal(kx, (B, S, D), jnp.float32)
    params = _init_params(kp, D, d_k, d_v, n_heads, d_ff)

    out = encoder_layer(x, params, n_heads=n_heads, d_k=d_k, d_v=d_v)
    out = jax.block_until_ready(out)

    ref = _reference(x, params, n_heads=n_heads, d_k=d_k, d_v=d_v)
    assert out.shape == (B, S, D)
    # bf16 matmul operands (f32 accumulation) -> relaxed tolerance vs f32 reference.
    max_err = float(jnp.max(jnp.abs(out - ref)))
    assert max_err < 3e-2, f"mismatch vs reference: max abs err {max_err}"

    print("KERNEL_OK")
</pallas_src>

<mosaic_0001>
module attributes {stable_mosaic.version = 11 : i64} {
  func.func @_encoder_layer_kernel(%arg0: i32, %arg1: i32, %arg2: memref<1x8x32xf32, #tpu.memory_space<vmem>>, %arg3: memref<1x8x32xbf16, #tpu.memory_space<vmem>>, %arg4: memref<32x96xbf16, #tpu.memory_space<vmem>>, %arg5: memref<1x96xf32, #tpu.memory_space<vmem>>, %arg6: memref<32x32xbf16, #tpu.memory_space<vmem>>, %arg7: memref<4x32xf32, #tpu.memory_space<vmem>>, %arg8: memref<32x64xbf16, #tpu.memory_space<vmem>>, %arg9: memref<1x64xf32, #tpu.memory_space<vmem>>, %arg10: memref<64x32xbf16, #tpu.memory_space<vmem>>, %arg11: memref<1x8x32xf32, #tpu.memory_space<vmem>>, %arg12: memref<8x64xbf16, #tpu.memory_space<vmem>>, %arg13: memref<8x32xbf16, #tpu.memory_space<vmem>>) attributes {dimension_semantics = [#tpu.dimension_semantics<parallel>, #tpu.dimension_semantics<arbitrary>], iteration_bounds = array<i64: 2, 1>, scalar_prefetch = 0 : i64, scratch_operands = 2 : i64, tpu.core_type = #tpu.core_type<tc>, window_params = [{transform_indices = @transform_0, window_bounds = array<i64: 1, 8, 32>}, {transform_indices = @transform_1, window_bounds = array<i64: 1, 8, 32>}, {pipeline_mode = #tpu.pipeline_mode<synchronous>, transform_indices = @transform_2, window_bounds = array<i64: 32, 96>}, {pipeline_mode = #tpu.pipeline_mode<synchronous>, transform_indices = @transform_3, window_bounds = array<i64: 1, 96>}, {pipeline_mode = #tpu.pipeline_mode<synchronous>, transform_indices = @transform_4, window_bounds = array<i64: 32, 32>}, {pipeline_mode = #tpu.pipeline_mode<synchronous>, transform_indices = @transform_5, window_bounds = array<i64: 4, 32>}, {pipeline_mode = #tpu.pipeline_mode<synchronous>, transform_indices = @transform_6, window_bounds = array<i64: 32, 64>}, {pipeline_mode = #tpu.pipeline_mode<synchronous>, transform_indices = @transform_7, window_bounds = array<i64: 1, 64>}, {pipeline_mode = #tpu.pipeline_mode<synchronous>, transform_indices = @transform_8, window_bounds = array<i64: 64, 32>}, {transform_indices = @transform_9, window_bounds = array<i64: 1, 8, 32>}]} {
    %c0_i32 = arith.constant 0 : i32
    %0 = arith.cmpi eq, %arg1, %c0_i32 : i32
    %1 = arith.extui %0 : i1 to i32
    %c0_i32_0 = arith.constant 0 : i32
    %2 = arith.cmpi ne, %1, %c0_i32_0 : i32
    scf.if %2 {
      %c0_70 = arith.constant 0 : index
      %c0_71 = arith.constant 0 : index
      %c0_72 = arith.constant 0 : index
      %143 = vector.load %arg3[%c0_70, %c0_71, %c0_72] : memref<1x8x32xbf16, #tpu.memory_space<vmem>>, vector<1x8x32xbf16>
      %144 = vector.shape_cast %143 : vector<1x8x32xbf16> to vector<8x32xbf16>
      %c0_73 = arith.constant 0 : index
      %c32_74 = arith.constant 32 : index
      %145 = vector.load %arg4[%c0_73, %c32_74] : memref<32x96xbf16, #tpu.memory_space<vmem>>, vector<32x64xbf16>
      %cst_75 = arith.constant dense<0.000000e+00> : vector<8x64xf32>
      %146 = tpu.matmul %144, %145, %cst_75 {dimension_numbers = #tpu.dot_dimension_numbers<[1], [0], [0], [1], [0, 0, 1, 1], [], []>} : vector<8x32xbf16>, vector<32x64xbf16>, vector<8x64xf32> -> vector<8x64xf32>
      %c0_76 = arith.constant 0 : index
      %c32_77 = arith.constant 32 : index
      %147 = vector.load %arg5[%c0_76, %c32_77] : memref<1x96xf32, #tpu.memory_space<vmem>>, vector<1x64xf32>
      %148 = vector.broadcast %147 : vector<1x64xf32> to vector<8x64xf32>
      %149 = arith.addf %146, %148 : vector<8x64xf32>
      %150 = arith.truncf %149 : vector<8x64xf32> to vector<8x64xbf16>
      %c0_78 = arith.constant 0 : index
      %c0_79 = arith.constant 0 : index
      %151 = vector.load %arg12[%c0_78, %c0_79] : memref<8x64xbf16, #tpu.memory_space<vmem>>, vector<8x64xbf16>
      tpu.vector_store %arg12[%c0_78, %c0_79], %150 {strides = array<i32>} : memref<8x64xbf16, #tpu.memory_space<vmem>>, vector<8x64xbf16>,
    } else {
    }
    %c0 = arith.constant 0 : index
    %c0_1 = arith.constant 0 : index
    %c0_2 = arith.constant 0 : index
    %3 = vector.load %arg2[%c0, %c0_1, %c0_2] : memref<1x8x32xf32, #tpu.memory_space<vmem>>, vector<1x8x32xf32>
    %4 = vector.shape_cast %3 : vector<1x8x32xf32> to vector<8x32xf32>
    %5 = arith.truncf %4 : vector<8x32xf32> to vector<8x32xbf16>
    %c0_3 = arith.constant 0 : index
    %c0_4 = arith.constant 0 : index
    %6 = vector.load %arg4[%c0_3, %c0_4] : memref<32x96xbf16, #tpu.memory_space<vmem>>, vector<32x32xbf16>
    %cst = arith.constant dense<0.000000e+00> : vector<8x32xf32>
    %7 = tpu.matmul %5, %6, %cst {dimension_numbers = #tpu.dot_dimension_numbers<[1], [0], [0], [1], [0, 0, 1, 1], [], []>} : vector<8x32xbf16>, vector<32x32xbf16>, vector<8x32xf32> -> vector<8x32xf32>
    %c0_5 = arith.constant 0 : index
    %c0_6 = arith.constant 0 : index
    %8 = vector.load %arg5[%c0_5, %c0_6] : memref<1x96xf32, #tpu.memory_space<vmem>>, vector<1x32xf32>
    %9 = vector.broadcast %8 : vector<1x32xf32> to vector<8x32xf32>
    %10 = arith.addf %7, %9 : vector<8x32xf32>
    %cst_7 = arith.constant 0.353553385 : f32
    %11 = vector.broadcast %cst_7 : f32 to vector<8x32xf32>
    %12 = arith.mulf %10, %11 : vector<8x32xf32>
    %13 = vector.extract_strided_slice %12 {offsets = [0, 0], sizes = [8, 8], strides = [1, 1]} : vector<8x32xf32> to vector<8x8xf32>
    %14 = arith.truncf %13 : vector<8x8xf32> to vector<8x8xbf16>
    %c0_8 = arith.constant 0 : index
    %c0_9 = arith.constant 0 : index
    %15 = vector.load %arg12[%c0_8, %c0_9] : memref<8x64xbf16, #tpu.memory_space<vmem>>, vector<8x8xbf16>
    %c0_10 = arith.constant 0 : index
    %c32 = arith.constant 32 : index
    %16 = vector.load %arg12[%c0_10, %c32] : memref<8x64xbf16, #tpu.memory_space<vmem>>, vector<8x8xbf16>
    %cst_11 = arith.constant dense<0.000000e+00> : vector<8x8xf32>
    %17 = tpu.matmul %14, %15, %cst_11 {dimension_numbers = #tpu.dot_dimension_numbers<[1], [1], [0], [0], [0, 0, 1, 0], [], []>} : vector<8x8xbf16>, vector<8x8xbf16>, vector<8x8xf32> -> vector<8x8xf32>
    %cst_12 = arith.constant dense<0xFF800000> : vector<8xf32>
    %18 = vector.multi_reduction <maximumf>, %17, %cst_12 [1] : vector<8x8xf32> to vector<8xf32>
    %19 = vector.shape_cast %18 : vector<8xf32> to vector<8x1xf32>
    %20 = vector.broadcast %19 : vector<8x1xf32> to vector<8x8xf32>
    %21 = arith.subf %17, %20 : vector<8x8xf32>
    %22 = math.exp %21 : vector<8x8xf32>
    %cst_13 = arith.constant dense<0.000000e+00> : vector<8xf32>
    %23 = vector.multi_reduction <add>, %22, %cst_13 [1] : vector<8x8xf32> to vector<8xf32>
    %24 = vector.shape_cast %23 : vector<8xf32> to vector<8x1xf32>
    %25 = tpu.reciprocal %24 {approx = true} : vector<8x1xf32> -> vector<8x1xf32>
    %26 = vector.broadcast %25 : vector<8x1xf32> to vector<8x8xf32>
    %27 = arith.mulf %22, %26 : vector<8x8xf32>
    %28 = arith.truncf %27 : vector<8x8xf32> to vector<8x8xbf16>
    %cst_14 = arith.constant dense<0.000000e+00> : vector<8x8xf32>
    %29 = tpu.matmul %28, %16, %cst_14 {dimension_numbers = #tpu.dot_dimension_numbers<[1], [0], [0], [1], [0, 0, 1, 1], [], []>} : vector<8x8xbf16>, vector<8x8xbf16>, vector<8x8xf32> -> vector<8x8xf32>
    %30 = arith.truncf %29 : vector<8x8xf32> to vector<8x8xbf16>
    %c0_15 = arith.constant 0 : index
    %c0_16 = arith.constant 0 : index
    %31 = vector.load %arg13[%c0_15, %c0_16] : memref<8x32xbf16, #tpu.memory_space<vmem>>, vector<8x8xbf16>
    tpu.vector_store %arg13[%c0_15, %c0_16], %30 {strides = array<i32>} : memref<8x32xbf16, #tpu.memory_space<vmem>>, vector<8x8xbf16>,
    %32 = vector.extract_strided_slice %12 {offsets = [0, 8], sizes = [8, 8], strides = [1, 1]} : vector<8x32xf32> to vector<8x8xf32>
    %33 = arith.truncf %32 : vector<8x8xf32> to vector<8x8xbf16>
    %c0_17 = arith.constant 0 : index
    %c8 = arith.constant 8 : index
    %34 = vector.load %arg12[%c0_17, %c8] : memref<8x64xbf16, #tpu.memory_space<vmem>>, vector<8x8xbf16>
    %c0_18 = arith.constant 0 : index
    %c40 = arith.constant 40 : index
    %35 = vector.load %arg12[%c0_18, %c40] : memref<8x64xbf16, #tpu.memory_space<vmem>>, vector<8x8xbf16>
    %cst_19 = arith.constant dense<0.000000e+00> : vector<8x8xf32>
    %36 = tpu.matmul %33, %34, %cst_19 {dimension_numbers = #tpu.dot_dimension_numbers<[1], [1], [0], [0], [0, 0, 1, 0], [], []>} : vector<8x8xbf16>, vector<8x8xbf16>, vector<8x8xf32> -> vector<8x8xf32>
    %cst_20 = arith.constant dense<0xFF800000> : vector<8xf32>
    %37 = vector.multi_reduction <maximumf>, %36, %cst_20 [1] : vector<8x8xf32> to vector<8xf32>
    %38 = vector.shape_cast %37 : vector<8xf32> to vector<8x1xf32>
    %39 = vector.broadcast %38 : vector<8x1xf32> to vector<8x8xf32>
    %40 = arith.subf %36, %39 : vector<8x8xf32>
    %41 = math.exp %40 : vector<8x8xf32>
    %cst_21 = arith.constant dense<0.000000e+00> : vector<8xf32>
    %42 = vector.multi_reduction <add>, %41, %cst_21 [1] : vector<8x8xf32> to vector<8xf32>
    %43 = vector.shape_cast %42 : vector<8xf32> to vector<8x1xf32>
    %44 = tpu.reciprocal %43 {approx = true} : vector<8x1xf32> -> vector<8x1xf32>
    %45 = vector.broadcast %44 : vector<8x1xf32> to vector<8x8xf32>
    %46 = arith.mulf %41, %45 : vector<8x8xf32>
    %47 = arith.truncf %46 : vector<8x8xf32> to vector<8x8xbf16>
    %cst_22 = arith.constant dense<0.000000e+00> : vector<8x8xf32>
    %48 = tpu.matmul %47, %35, %cst_22 {dimension_numbers = #tpu.dot_dimension_numbers<[1], [0], [0], [1], [0, 0, 1, 1], [], []>} : vector<8x8xbf16>, vector<8x8xbf16>, vector<8x8xf32> -> vector<8x8xf32>
    %49 = arith.truncf %48 : vector<8x8xf32> to vector<8x8xbf16>
    %c0_23 = arith.constant 0 : index
    %c8_24 = arith.constant 8 : index
    %50 = vector.load %arg13[%c0_23, %c8_24] : memref<8x32xbf16, #tpu.memory_space<vmem>>, vector<8x8xbf16>
    tpu.vector_store %arg13[%c0_23, %c8_24], %49 {strides = array<i32>} : memref<8x32xbf16, #tpu.memory_space<vmem>>, vector<8x8xbf16>,
    %51 = vector.extract_strided_slice %12 {offsets = [0, 16], sizes = [8, 8], strides = [1, 1]} : vector<8x32xf32> to vector<8x8xf32>
    %52 = arith.truncf %51 : vector<8x8xf32> to vector<8x8xbf16>
    %c0_25 = arith.constant 0 : index
    %c16 = arith.constant 16 : index
    %53 = vector.load %arg12[%c0_25, %c16] : memref<8x64xbf16, #tpu.memory_space<vmem>>, vector<8x8xbf16>
    %c0_26 = arith.constant 0 : index
    %c48 = arith.constant 48 : index
    %54 = vector.load %arg12[%c0_26, %c48] : memref<8x64xbf16, #tpu.memory_space<vmem>>, vector<8x8xbf16>
    %cst_27 = arith.constant dense<0.000000e+00> : vector<8x8xf32>
    %55 = tpu.matmul %52, %53, %cst_27 {dimension_numbers = #tpu.dot_dimension_numbers<[1], [1], [0], [0], [0, 0, 1, 0], [], []>} : vector<8x8xbf16>, vector<8x8xbf16>, vector<8x8xf32> -> vector<8x8xf32>
    %cst_28 = arith.constant dense<0xFF800000> : vector<8xf32>
    %56 = vector.multi_reduction <maximumf>, %55, %cst_28 [1] : vector<8x8xf32> to vector<8xf32>
    %57 = vector.shape_cast %56 : vector<8xf32> to vector<8x1xf32>
    %58 = vector.broadcast %57 : vector<8x1xf32> to vector<8x8xf32>
    %59 = arith.subf %55, %58 : vector<8x8xf32>
    %60 = math.exp %59 : vector<8x8xf32>
    %cst_29 = arith.constant dense<0.000000e+00> : vector<8xf32>
    %61 = vector.multi_reduction <add>, %60, %cst_29 [1] : vector<8x8xf32> to vector<8xf32>
    %62 = vector.shape_cast %61 : vector<8xf32> to vector<8x1xf32>
    %63 = tpu.reciprocal %62 {approx = true} : vector<8x1xf32> -> vector<8x1xf32>
    %64 = vector.broadcast %63 : vector<8x1xf32> to vector<8x8xf32>
    %65 = arith.mulf %60, %64 : vector<8x8xf32>
    %66 = arith.truncf %65 : vector<8x8xf32> to vector<8x8xbf16>
    %cst_30 = arith.constant dense<0.000000e+00> : vector<8x8xf32>
    %67 = tpu.matmul %66, %54, %cst_30 {dimension_numbers = #tpu.dot_dimension_numbers<[1], [0], [0], [1], [0, 0, 1, 1], [], []>} : vector<8x8xbf16>, vector<8x8xbf16>, vector<8x8xf32> -> vector<8x8xf32>
    %68 = arith.truncf %67 : vector<8x8xf32> to vector<8x8xbf16>
    %c0_31 = arith.constant 0 : index
    %c16_32 = arith.constant 16 : index
    %69 = vector.load %arg13[%c0_31, %c16_32] : memref<8x32xbf16, #tpu.memory_space<vmem>>, vector<8x8xbf16>
    tpu.vector_store %arg13[%c0_31, %c16_32], %68 {strides = array<i32>} : memref<8x32xbf16, #tpu.memory_space<vmem>>, vector<8x8xbf16>,
    %70 = vector.extract_strided_slice %12 {offsets = [0, 24], sizes = [8, 8], strides = [1, 1]} : vector<8x32xf32> to vector<8x8xf32>
    %71 = arith.truncf %70 : vector<8x8xf32> to vector<8x8xbf16>
    %c0_33 = arith.constant 0 : index
    %c24 = arith.constant 24 : index
    %72 = vector.load %arg12[%c0_33, %c24] : memref<8x64xbf16, #tpu.memory_space<vmem>>, vector<8x8xbf16>
    %c0_34 = arith.constant 0 : index
    %c56 = arith.constant 56 : index
    %73 = vector.load %arg12[%c0_34, %c56] : memref<8x64xbf16, #tpu.memory_space<vmem>>, vector<8x8xbf16>
    %cst_35 = arith.constant dense<0.000000e+00> : vector<8x8xf32>
    %74 = tpu.matmul %71, %72, %cst_35 {dimension_numbers = #tpu.dot_dimension_numbers<[1], [1], [0], [0], [0, 0, 1, 0], [], []>} : vector<8x8xbf16>, vector<8x8xbf16>, vector<8x8xf32> -> vector<8x8xf32>
    %cst_36 = arith.constant dense<0xFF800000> : vector<8xf32>
    %75 = vector.multi_reduction <maximumf>, %74, %cst_36 [1] : vector<8x8xf32> to vector<8xf32>
    %76 = vector.shape_cast %75 : vector<8xf32> to vector<8x1xf32>
    %77 = vector.broadcast %76 : vector<8x1xf32> to vector<8x8xf32>
    %78 = arith.subf %74, %77 : vector<8x8xf32>
    %79 = math.exp %78 : vector<8x8xf32>
    %cst_37 = arith.constant dense<0.000000e+00> : vector<8xf32>
    %80 = vector.multi_reduction <add>, %79, %cst_37 [1] : vector<8x8xf32> to vector<8xf32>
    %81 = vector.shape_cast %80 : vector<8xf32> to vector<8x1xf32>
    %82 = tpu.reciprocal %81 {approx = true} : vector<8x1xf32> -> vector<8x1xf32>
    %83 = vector.broadcast %82 : vector<8x1xf32> to vector<8x8xf32>
    %84 = arith.mulf %79, %83 : vector<8x8xf32>
    %85 = arith.truncf %84 : vector<8x8xf32> to vector<8x8xbf16>
    %cst_38 = arith.constant dense<0.000000e+00> : vector<8x8xf32>
    %86 = tpu.matmul %85, %73, %cst_38 {dimension_numbers = #tpu.dot_dimension_numbers<[1], [0], [0], [1], [0, 0, 1, 1], [], []>} : vector<8x8xbf16>, vector<8x8xbf16>, vector<8x8xf32> -> vector<8x8xf32>
    %87 = arith.truncf %86 : vector<8x8xf32> to vector<8x8xbf16>
    %c0_39 = arith.constant 0 : index
    %c24_40 = arith.constant 24 : index
    %88 = vector.load %arg13[%c0_39, %c24_40] : memref<8x32xbf16, #tpu.memory_space<vmem>>, vector<8x8xbf16>
    tpu.vector_store %arg13[%c0_39, %c24_40], %87 {strides = array<i32>} : memref<8x32xbf16, #tpu.memory_space<vmem>>, vector<8x8xbf16>,
    %c0_41 = arith.constant 0 : index
    %c0_42 = arith.constant 0 : index
    %89 = vector.load %arg7[%c0_41, %c0_42] : memref<4x32xf32, #tpu.memory_space<vmem>>, vector<1x32xf32>
    %c1 = arith.constant 1 : index
    %c0_43 = arith.constant 0 : index
    %90 = vector.load %arg7[%c1, %c0_43] : memref<4x32xf32, #tpu.memory_space<vmem>>, vector<1x32xf32>
    %c2 = arith.constant 2 : index
    %c0_44 = arith.constant 0 : index
    %91 = vector.load %arg7[%c2, %c0_44] : memref<4x32xf32, #tpu.memory_space<vmem>>, vector<1x32xf32>
    %c3 = arith.constant 3 : index
    %c0_45 = arith.constant 0 : index
    %92 = vector.load %arg7[%c3, %c0_45] : memref<4x32xf32, #tpu.memory_space<vmem>>, vector<1x32xf32>
    %c0_46 = arith.constant 0 : index
    %c0_47 = arith.constant 0 : index
    %93 = vector.load %arg13[%c0_46, %c0_47] : memref<8x32xbf16, #tpu.memory_space<vmem>>, vector<8x32xbf16>
    %c0_48 = arith.constant 0 : index
    %c0_49 = arith.constant 0 : index
    %94 = vector.load %arg6[%c0_48, %c0_49] : memref<32x32xbf16, #tpu.memory_space<vmem>>, vector<32x32xbf16>
    %cst_50 = arith.constant dense<0.000000e+00> : vector<8x32xf32>
    %95 = tpu.matmul %93, %94, %cst_50 {dimension_numbers = #tpu.dot_dimension_numbers<[1], [0], [0], [1], [0, 0, 1, 1], [], []>} : vector<8x32xbf16>, vector<32x32xbf16>, vector<8x32xf32> -> vector<8x32xf32>
    %96 = vector.broadcast %89 : vector<1x32xf32> to vector<8x32xf32>
    %97 = arith.addf %95, %96 : vector<8x32xf32>
    %98 = arith.addf %97, %4 : vector<8x32xf32>
    %cst_51 = arith.constant dense<0.000000e+00> : vector<8xf32>
    %99 = vector.multi_reduction <add>, %98, %cst_51 [1] : vector<8x32xf32> to vector<8xf32>
    %100 = vector.shape_cast %99 : vector<8xf32> to vector<8x1xf32>
    %cst_52 = arith.constant 3.200000e+01 : f32
    %101 = vector.broadcast %cst_52 : f32 to vector<8x1xf32>
    %102 = arith.divf %100, %101 : vector<8x1xf32>
    %103 = vector.broadcast %102 : vector<8x1xf32> to vector<8x32xf32>
    %104 = arith.subf %98, %103 : vector<8x32xf32>
    %105 = arith.mulf %104, %104 : vector<8x32xf32>
    %cst_53 = arith.constant dense<0.000000e+00> : vector<8xf32>
    %106 = vector.multi_reduction <add>, %105, %cst_53 [1] : vector<8x32xf32> to vector<8xf32>
    %107 = vector.shape_cast %106 : vector<8xf32> to vector<8x1xf32>
    %cst_54 = arith.constant 3.200000e+01 : f32
    %108 = vector.broadcast %cst_54 : f32 to vector<8x1xf32>
    %109 = arith.divf %107, %108 : vector<8x1xf32>
    %110 = vector.broadcast %102 : vector<8x1xf32> to vector<8x32xf32>
    %111 = arith.subf %98, %110 : vector<8x32xf32>
    %cst_55 = arith.constant 9.99999974E-6 : f32
    %112 = vector.broadcast %cst_55 : f32 to vector<8x1xf32>
    %113 = arith.addf %109, %112 : vector<8x1xf32>
    %114 = math.rsqrt %113 : vector<8x1xf32>
    %115 = vector.broadcast %114 : vector<8x1xf32> to vector<8x32xf32>
    %116 = arith.mulf %111, %115 : vector<8x32xf32>
    %117 = vector.broadcast %90 : vector<1x32xf32> to vector<8x32xf32>
    %118 = arith.mulf %116, %117 : vector<8x32xf32>
    %119 = vector.broadcast %91 : vector<1x32xf32> to vector<8x32xf32>
    %120 = arith.addf %118, %119 : vector<8x32xf32>
    %121 = arith.truncf %120 : vector<8x32xf32> to vector<8x32xbf16>
    %c0_56 = arith.constant 0 : index
    %c0_57 = arith.constant 0 : index
    %122 = vector.load %arg8[%c0_56, %c0_57] : memref<32x64xbf16, #tpu.memory_space<vmem>>, vector<32x64xbf16>
    %cst_58 = arith.constant dense<0.000000e+00> : vector<8x64xf32>
    %123 = tpu.matmul %121, %122, %cst_58 {dimension_numbers = #tpu.dot_dimension_numbers<[1], [0], [0], [1], [0, 0, 1, 1], [], []>} : vector<8x32xbf16>, vector<32x64xbf16>, vector<8x64xf32> -> vector<8x64xf32>
    %c0_59 = arith.constant 0 : index
    %c0_60 = arith.constant 0 : index
    %124 = vector.load %arg9[%c0_59, %c0_60] : memref<1x64xf32, #tpu.memory_space<vmem>>, vector<1x64xf32>
    %125 = vector.broadcast %124 : vector<1x64xf32> to vector<8x64xf32>
    %126 = arith.addf %123, %125 : vector<8x64xf32>
    %cst_61 = arith.constant 5.000000e-01 : f32
    %127 = vector.broadcast %cst_61 : f32 to vector<8x64xf32>
    %128 = arith.mulf %126, %127 : vector<8x64xf32>
    %cst_62 = arith.constant 0.707106769 : f32
    %129 = vector.broadcast %cst_62 : f32 to vector<8x64xf32>
    %130 = arith.mulf %126, %129 : vector<8x64xf32>
    %131 = math.erf %130 : vector<8x64xf32>
    %cst_63 = arith.constant 1.000000e+00 : f32
    %132 = vector.broadcast %cst_63 : f32 to vector<8x64xf32>
    %133 = arith.addf %132, %131 : vector<8x64xf32>
    %134 = arith.mulf %128, %133 : vector<8x64xf32>
    %135 = arith.truncf %134 : vector<8x64xf32> to vector<8x64xbf16>
    %c0_64 = arith.constant 0 : index
    %c0_65 = arith.constant 0 : index
    %136 = vector.load %arg10[%c0_64, %c0_65] : memref<64x32xbf16, #tpu.memory_space<vmem>>, vector<64x32xbf16>
    %cst_66 = arith.constant dense<0.000000e+00> : vector<8x32xf32>
    %137 = tpu.matmul %135, %136, %cst_66 {dimension_numbers = #tpu.dot_dimension_numbers<[1], [0], [0], [1], [0, 0, 1, 1], [], []>} : vector<8x64xbf16>, vector<64x32xbf16>, vector<8x32xf32> -> vector<8x32xf32>
    %138 = vector.broadcast %92 : vector<1x32xf32> to vector<8x32xf32>
    %139 = arith.addf %137, %138 : vector<8x32xf32>
    %c0_67 = arith.constant 0 : index
    %c0_68 = arith.constant 0 : index
    %c0_69 = arith.constant 0 : index
    %140 = vector.load %arg11[%c0_67, %c0_68, %c0_69] : memref<1x8x32xf32, #tpu.memory_space<vmem>>, vector<1x8x32xf32>
    %141 = vector.shape_cast %140 : vector<1x8x32xf32> to vector<8x32xf32>
    %142 = vector.shape_cast %139 : vector<8x32xf32> to vector<1x8x32xf32>
    tpu.vector_store %arg11[%c0_67, %c0_68, %c0_69], %142 {strides = array<i32>} : memref<1x8x32xf32, #tpu.memory_space<vmem>>, vector<1x8x32xf32>,
    return
  }
  func.func @transform_0(%arg0: i32, %arg1: i32) -> (i32, i32, i32) {
    %c0_i32 = arith.constant 0 : i32
    %c0_i32_0 = arith.constant 0 : i32
    return %arg0, %arg1, %c0_i32 : i32, i32, i32
  }
  func.func @transform_1(%arg0: i32, %arg1: i32) -> (i32, i32, i32) {
    %c0_i32 = arith.constant 0 : i32
    %c0_i32_0 = arith.constant 0 : i32
    %c0_i32_1 = arith.constant 0 : i32
    return %arg0, %c0_i32, %c0_i32_0 : i32, i32, i32
  }
  func.func @transform_2(%arg0: i32, %arg1: i32) -> (i32, i32) {
    %c0_i32 = arith.constant 0 : i32
    %c0_i32_0 = arith.constant 0 : i32
    %c0_i32_1 = arith.constant 0 : i32
    return %c0_i32, %c0_i32_0 : i32, i32
  }
  func.func @transform_3(%arg0: i32, %arg1: i32) -> (i32, i32) {
    %c0_i32 = arith.constant 0 : i32
    %c0_i32_0 = arith.constant 0 : i32
    %c0_i32_1 = arith.constant 0 : i32
    return %c0_i32, %c0_i32_0 : i32, i32
  }
  func.func @transform_4(%arg0: i32, %arg1: i32) -> (i32, i32) {
    %c0_i32 = arith.constant 0 : i32
    %c0_i32_0 = arith.constant 0 : i32
    %c0_i32_1 = arith.constant 0 : i32
    return %c0_i32, %c0_i32_0 : i32, i32
  }
  func.func @transform_5(%arg0: i32, %arg1: i32) -> (i32, i32) {
    %c0_i32 = arith.constant 0 : i32
    %c0_i32_0 = arith.constant 0 : i32
    %c0_i32_1 = arith.constant 0 : i32
    return %c0_i32, %c0_i32_0 : i32, i32
  }
  func.func @transform_6(%arg0: i32, %arg1: i32) -> (i32, i32) {
    %c0_i32 = arith.constant 0 : i32
    %c0_i32_0 = arith.constant 0 : i32
    %c0_i32_1 = arith.constant 0 : i32
    return %c0_i32, %c0_i32_0 : i32, i32
  }
  func.func @transform_7(%arg0: i32, %arg1: i32) -> (i32, i32) {
    %c0_i32 = arith.constant 0 : i32
    %c0_i32_0 = arith.constant 0 : i32
    %c0_i32_1 = arith.constant 0 : i32
    return %c0_i32, %c0_i32_0 : i32, i32
  }
  func.func @transform_8(%arg0: i32, %arg1: i32) -> (i32, i32) {
    %c0_i32 = arith.constant 0 : i32
    %c0_i32_0 = arith.constant 0 : i32
    %c0_i32_1 = arith.constant 0 : i32
    return %c0_i32, %c0_i32_0 : i32, i32
  }
  func.func @transform_9(%arg0: i32, %arg1: i32) -> (i32, i32, i32) {
    %c0_i32 = arith.constant 0 : i32
    %c0_i32_0 = arith.constant 0 : i32
    return %arg0, %arg1, %c0_i32 : i32, i32, i32
  }
}

</mosaic_0001>

<bundles_post_ra>
// kernel: tpu_custom_call.1
= control target key start
LH: loop header
LB: loop body
LE: loop exit
PB: predicated region body
PF: predicated region fallthrough
CT: control target
= control target key end

     0   :  { %s2299_s0 = inlined_call_operand.vmem [shape: f32[2,8,32], index: 0, kind: input, shape index: {}]   ;;  %s2300_s1 = inlined_call_operand.hbm [shape: bf16[2,8,32], index: 1, kind: input, shape index: {}]   ;;  %s2301_s2 = inlined_call_operand.vmem [shape: bf16[32,96], index: 2, kind: input, shape index: {}]   ;;  %s2302_s3 = inlined_call_operand.vmem [shape: f32[1,96], index: 3, kind: input, shape index: {}]   ;;  %s2303_s4 = inlined_call_operand.vmem [shape: bf16[32,32], index: 4, kind: input, shape index: {}]   ;;  %s2304_s5 = inlined_call_operand.vmem [shape: f32[4,32], index: 5, kind: input, shape index: {}]   ;;  %s2305_s6 = inlined_call_operand.hbm [shape: bf16[32,64], index: 6, kind: input, shape index: {}]   ;;  %s2306_s7 = inlined_call_operand.vmem [shape: f32[1,64], index: 7, kind: input, shape index: {}]   ;;  %s2307_s8 = inlined_call_operand.vmem [shape: bf16[64,32], index: 8, kind: input, shape index: {}]   ;;  %s2308_s9 = inlined_call_operand.hbm [shape: f32[2,8,32], index: 9, kind: output, shape index: {}]  }
   0x1   :  { %2316 = sst [smem:[#allocation16_spill]] %s2305_s6 }
   0x2   :  { %14 = vsyncpa [#allocation5], 0 }
   0x3   :  { %16 = vsyncpa [#allocation5 + $0x1], 0 }
   0x4   :  { %17 = vsyncpa [#allocation8], 0 }
   0x5   :  { %18 = vsyncpa [#allocation6], 0 }
   0x6   :  { %20 = vsyncpa [#allocation6 + $0x1], 0  ;;  %s1928_s30 = smov 0   ;;  %s1930_s10 = smov 0  }
   0x7   :  { %s1932_s11 = smov 0   ;;  %s1934_s12 = smov 0  }
   0x8   :  { %s1936_s13 = smov 0   ;;  %s1938_s14 = smov 0  }
   0x9 LB: > { %2317 = sst [smem:[#allocation13_spill]] %s1839_s30  ;;  %s1409_s15 = sadd.s32 4294967295, %s1859_s14   ;;  %s1859_s14 = sphi %s1938_s14, %s26_s14   ;;  %s1855_s13 = sphi %s1936_s13, %s2343_s13   ;;  %s1851_s12 = sphi %s1934_s12, %s2342_s12   ;;  %s1847_s11 = sphi %s1932_s11, %s2341_s11   ;;  %s1843_s10 = sphi %s1930_s10, %s2340_s10   ;;  %s1839_s30 = sphi %s1928_s30, %s2339_s30  }
   0xa   : > { %s1410_s16 = sadd.s32 4294967294, %s1859_s14   ;;  %p86_p0 = scmp.ne.s32.totalorder %s1843_s10, %s1839_s30 }
   0xb   : > { %p1962_p1 = scmp.eq.s32.totalorder %s1409_s15, 0  ;;  %p1966_p2 = scmp.eq.s32.totalorder %s1409_s15, 1 }
   0xc   : > { %p265_p3 = scmp.eq.s32.totalorder %s1410_s16, 1  ;;  %p1411_p5 = scmp.ge.s32.totalorder %s1859_s14, 1 }
   0xd   : > { %s2318_s17 = scalar_select %p1962_p1, 1, 0 }
   0xe   : > { %s2319_s18 = scalar_select %p1966_p2, 1, 0 }
   0xf   : > { %p1972_p4 = por %p1962_p1, %p86_p0  ;;  %p1977_p6 = por %p265_p3, %p86_p0 }
  0x10   : > { %p272_p7 = scmp.lt.s32.totalorder %s1859_s14, 3  ;;  %s1861_s22 = smov [#allocation7]  }
  0x11   : > { %s2320_s19 = scalar_select %p1972_p4, 1, 0 }
  0x12   : > { %s2321_s20 = scalar_select %p1977_p6, 1, 0 }
  0x13   : > { %p1982_p8 = pnand %p1411_p5, %p272_p7  ;;  %s296_s23 = sshll.u32 %s1861_s22, 4  ;;  %s297_s23 = int_to_ptr.vmem [resolvable:$true] %s296_s23 }
  0x14   : > { %2322 = sst [smem:[#allocation14_spill]] %s2321_s20  ;;  %s38_s25 = sadd.s32 1, %s1855_s13 }
  0x15   : > { %s2323_s21 = scalar_select %p1982_p8, 1, 0 }
  0x16   : > { %p1600_p9 = pneg %p1982_p8  ;;  %s2325_s6 = sld [smem:[#allocation16_spill]] }
  0x18   : > { %p1991_p11 = pnand %p1600_p9, %p1962_p1 }
  0x1a   : > { %p1717_p13 = pneg %p1991_p11 }
  0x1c   : > { %s1715_s28 = scalar_lea.hbm %s2325_s6, 256 }
  0x1d   : > { %p1716_p12 = scmp.ne.s32.totalorder %s2325_s6, %s1715_s28  ;;  %p1722_p5 = scmp.lt.u32.totalorder %s1715_s28, %s2325_s6 }
  0x1f   : > { %p1718_p0 = pnand %p1717_p13, %p1716_p12 }
  0x21   : > { %p1719_p3 = pneg %p1718_p0 }
  0x23   : > { %p1724_p7 = pnand %p1722_p5, %p1719_p3 }
  0x25   : > { %1727 = shalt.err (!%p1724_p7)
}
  0x26   : > { %s1728_s20 = scalar_lea.vmem %s297_s23, 256  ;;  %p1736_p1 = scmp.lt.s32.totalorder %s297_s23, %s297_s23 }
  0x27   : > { %p1729_p9 = scmp.ne.s32.totalorder %s297_s23, %s1728_s20  ;;  %p1737_p4 = scmp.lt.s32.totalorder %s1728_s20, %s1728_s20 }
  0x29   : > { %p1731_p10 = pnand %p1729_p9, %p1717_p13  ;;  %p1738_p8 = por %p1737_p4, %p1736_p1 }
  0x2b   : > { %p1732_p6 = pneg %p1731_p10 }
  0x2d   : > { %p1739_p2 = pnand %p1738_p8, %p1732_p6 }
  0x2f   : > { %1742 = shalt.err (!%p1739_p2)
}
  0x30   : > { %s1862_s26 = smov 64   ;;  %s1863_s27 = smov 4  }
  0x31   : > { %1603 = dma.hbm_to_vmem [thread:$0]  (!%p1991_p11), %s2325_s6, 256, %s297_s23, [#allocation8], %s1862_s26, %s1862_s26, %s1863_s27  }
  0x32   : > { %p40_p1 = scmp.ge.s32.totalorder %s38_s25, 2  ;;  %s73_s20 = sadd.s32 1, %s1847_s11 }
  0x33   : > { %p80_p2 = scmp.ne.s32.totalorder %s1847_s11, %s1843_s10  ;;  %p81_p4 = scmp.eq.s32.totalorder %s1859_s14, 0 }
  0x34   : > { %s2345_s25 = smov (%p40_p1, %s38_s25), 0  ;;  %p2328_p8 = scmp.ne.s32.totalorder %s2319_s18, 0 }
  0x35   : > { %2326 = sst [smem:[#allocation15_spill]] %s2345_s25  ;;  %p2018_p6 = por %p81_p4, %p80_p2 }
  0x36   : > { %p2024_p10 = por %p2328_p8, %p80_p2  ;;  %s70_s24 = ssub.s32 %s1855_s13, %s2345_s25 }
  0x37   : > { %p1613_p12 = scmp.lt.s32.totalorder %s1859_s14, 2  ;;  %p71_p11 = scmp.eq.s32.totalorder %s70_s24, 0 }
  0x38   : > { %s326_s23 = sand.u32 1, %s1847_s11   ;;  %s1415_s27 = sshll.u32 %s1855_s13, 6 }
  0x39   : > { %s1414_s22 = sshll.u32 %s326_s23, 2  ;;  %s2039_s6 = scalar_lea.hbm %s2300_s1, %s1415_s27 }
  0x3a   : > { %s2033_s26 = scalar_select %p71_p11, %s1847_s11, %s73_s20  }
  0x3b   : > { %s330_s18 = scalar_lea.vmem [#allocation4], %s1414_s22  ;;  %p2045_p13 = pnand %p1613_p12, %p2018_p6 }
  0x3c   : > { %s337_s30 = sshll.u32 %s330_s18, 4  ;;  %s327_s20 = scalar_lea.sflag [#allocation5], %s326_s23  ;;  %s2041_s30 = int_to_ptr.vmem [resolvable:$true] %s337_s30 }
  0x3d   : > { %s1743_s25 = scalar_lea.hbm %s2039_s6, 64  ;;  %p1745_p3 = pneg %p2045_p13 }
  0x3e   : > { %p1744_p0 = scmp.ne.s32.totalorder %s2039_s6, %s1743_s25  ;;  %s1748_s28 = scalar_lea.hbm %s2300_s1, 128 }
  0x3f   : > { %p1749_p9 = scmp.lt.u32.totalorder %s2039_s6, %s2300_s1  ;;  %p1750_p1 = scmp.lt.u32.totalorder %s1748_s28, %s1743_s25 }
  0x40   : > { %p1746_p5 = pnand %p1745_p3, %p1744_p0  ;;  %p1752_p4 = scmp.lt.u32.totalorder %s1743_s25, %s2039_s6 }
  0x41   : > { %p1751_p2 = por %p1750_p1, %p1749_p9 }
  0x42   : > { %p1747_p7 = pneg %p1746_p5 }
  0x43   : > { %p1753_p6 = por %p1752_p4, %p1751_p2 }
  0x45   : > { %p1754_p8 = pnand %p1753_p6, %p1747_p7 }
  0x47   : > { %1757 = shalt.err (!%p1754_p8)
}
  0x48   : > { %s1758_s23 = scalar_lea.vmem %s2041_s30, 64  ;;  %s1864_s18 = smov [#allocation4]  }
  0x49   : > { %p1759_p12 = scmp.ne.s32.totalorder %s2041_s30, %s1758_s23  ;;  %s1763_s22 = sshll.u32 %s1864_s18, 4  ;;  %s1764_s22 = int_to_ptr.vmem [resolvable:$false] %s1763_s22 }
  0x4a   : > { %s1765_s27 = scalar_lea.vmem %s1764_s22, 128  ;;  %p1766_p5 = scmp.lt.s32.totalorder %s2041_s30, %s1764_s22 }
  0x4b   : > { %p1761_p11 = pnand %p1759_p12, %p1745_p3  ;;  %p1767_p9 = scmp.lt.s32.totalorder %s1765_s27, %s1758_s23 }
  0x4d   : > { %p1762_p0 = pneg %p1761_p11  ;;  %p1768_p1 = por %p1767_p9, %p1766_p5 }
  0x4f   : > { %p1769_p2 = pnand %p1768_p1, %p1762_p0 }
  0x51   : > { %1772 = shalt.err (!%p1769_p2)
}
  0x52   : > { %1607 = dma.hbm_to_vmem [thread:$0]  (!%p2045_p13), %s2039_s6, 64, %s2041_s30, %s327_s20  }
  0x53   : > { %p2331_p7 = scmp.ne.s32.totalorder %s2323_s21, 0 }
  0x54   : > { %s2077_s25 = sand.u32 (!%p2331_p7), 1, %s1843_s10   ;;  %p2332_p3 = scmp.ne.s32.totalorder (!%p2331_p7), %s2320_s19, 0 }
  0x55   : > { %346 = sbr.rel (%p2331_p7) target bundleno = 2480 (0x9b0), region = 56  ;;  %s1417_s28 = sshll.u32 (!%p2331_p7), %s2077_s25, 2 }
  0x56   : > { %s349_s15 = scalar_lea.sflag (!%p2331_p7), [#allocation5], %s2077_s25  ;;  %s352_s29 = scalar_lea.vmem (!%p2331_p7), [#allocation4], %s1417_s28 }
  0x5c   : > { %1826 = dma.done.wait (%p2332_p3), %s349_s15, 64  }
  0x5d   : > { %1828 = vsyncadd (%p2332_p3), %s349_s15, 4294967232  ;;  %p2333_p4 = scmp.ne.s32.totalorder %s2318_s17, 0 }
  0x5f   : > { %1830 = dma.done.wait (%p2333_p4), [#allocation8], 256  }
  0x60   : > { %1832 = vsyncadd (%p2333_p4), [#allocation8], 4294967040  ;;  %v1865_v0 = vmov 0.0   ;;  %vm1866_vm0 = vmmov 0   ;;  %v1679_v1 = vld [vmem:[%s2301_s2] sm:$0xff]   ;;  %s1867_s17 = smov 96  }
  0x61   : > { %1500 = vmatprep.subr.bf16.mxu1 %v1865_v0  ;;  %1504 = vmatprep.mubr.msk.bf16.mxu1 %vm1866_vm0, %v1865_v0  ;;  %v1680_v2 = vld [vmem:[%s2301_s2 + $0x8] sm:$0xff]   ;;  %v1421_v3 = vld [vmem:[%s2302_s3] ss:$0 sm:$0xff]  ;;  %p398_p13 = scmp.lt.s32.totalorder %s1851_s12, 1  ;;  %vm440_vm1 = vcmask 261120   ;;  %vm485_vm2 = vcmask 519168  }
  0x62   : > { %1516 = vmatprep.subr.bf16.mxu0 %v1865_v0  ;;  %1518 = vmatprep.mubr.msk.bf16.mxu0 %vm1866_vm0, %v1865_v0  ;;  %v410_v6 = vld [vmem:[%s352_s29] sm:$0xf]  ;;  %v1681_v7 = vld [vmem:[%s2301_s2] sm:$0xff]   ;;  %vm559_vm3 = vcmask 64512   ;;  %s1868_s29 = smov 120   ;;  %s1869_s21 = smov 112  }
  0x63   : > { %431 = vrot.lane.b32.xlu0 %v1679_v1, %s1867_s17  ;;  %437 = vrot.lane.b32.xlu1 %v1421_v3, %s1867_s17  ;;  %s399_s23 = scalar_select %p398_p13, %s1851_s12, 1  ;;  %v1682_v8 = vld [vmem:[%s2301_s2 + $0x8] sm:$0xff]   ;;  %vm626_vm4 = vcmask 1043456   ;;  %vm671_vm5 = vcmask 60416   ;;  %vm795_vm6 = vcmask 126016   ;;  %vm918_vm7 = vcmask 191616  }
  0x64   : > { %s1870_s24 = smov 104   ;;  %s1871_s20 = smov 88   ;;  %vm1041_vm8 = vcmask 257216   ;;  %vm1245_vm9 = vcmask 523264  }
  0x65   : > { %s1420_s18 = sshll.u32 %s399_s23, 3  ;;  %s1872_s23 = smov 72  }
  0x66   : > { %s404_s6 = scalar_lea.vmem %s2299_s0, %s1420_s18  ;;  %s1873_s18 = smov 80  }
  0x67   : > { %433 = vrot.lane.b32.xlu0 %v1680_v2, %s1867_s17  ;;  %v2123_v9 = vld [vmem:[%s404_s6] sm:$0xff]  ;;  %s1875_s6 = smov 16   ;;  %s1876_s30 = smov 24  }
  0x68   : > { %v488_v10 = vpack.c.bf16 %v2123_v9, %v2123_v9 }
  0xd5   : > { %v432_v4 = vpop.permute.xlu0 %431  ;;  %v438_v11 = vpop.permute.xlu1 %437 }
  0xd6   : > { %1501 = vmatpush3.bf16.msra.mxu1 %v432_v4 }
  0xd7   : > { %1502 = vmatprep.subr.bf16.mxu1 %v1865_v0 }
  0xd9   : > { %v434_v5 = vpop.permute.xlu0 %433 }
  0xda   : > { %1503 = vmatpush3.bf16.msra.mxu1 %v434_v5 }
  0xdb   : > { %1508 = vmatprep.subr.bf16.mxu1 %v1865_v0 }
  0xdd   : > { %1505 = vmatmul.mubr.msk.bf16.vlgmr.msra.gmra.mrb[0].mxu1 %vm440_vm1, %v410_v6 }
  0xde   : > { %1509 = vmatpush3.bf16.msra.mxu1 %v1681_v7  ;;  %1512 = vmatprep.mubr.msk.bf16.mxu1 %vm1866_vm0, %v1865_v0 }
  0xdf   : > { %1510 = vmatprep.subr.bf16.mxu1 %v1865_v0 }
  0xe2   : > { %1511 = vmatpush3.bf16.msra.mxu1 %v1682_v8 }
  0xe3   : > { %1522 = vmatprep.subr.bf16.mxu1 %v1865_v0 }
  0xe5   : > { %1513 = vmatmul.mubr.msk.bf16.vlgmr.msra.gmra.mrb[4].mxu1 %vm440_vm1, %v488_v10 }
  0xe6   : > { %1524 = vmatprep.mubr.msk.bf16.mxu1 %vm1866_vm0, %v1865_v0 }
 0x1b0   : > { %v478_v12 = vpop.f32.mrb[0].mxu1 }
 0x1b1   : > { %v479_v13 = vadd.f32 %v478_v12, %v438_v11  ;;  %v1506_v14 = vpop.f32.mrb[1].mxu1 }
 0x1b2   : > { %v481_v15 = vpop.f32.mrb[2].mxu1 }
 0x1b3   : > { %v484_v16 = vpack.c.bf16 %v479_v13, %v479_v13  ;;  %v1507_v17 = vpop.f32.mrb[3].mxu1 }
 0x1b5   : > { %486 = vst.msk [vmem:[#allocation2] sm:$0xf] %vm485_vm2, %v484_v16 }
 0x1b8   : > { %v550_v18 = vpop.f32.mrb[4].mxu1 }
 0x1b9   : > { %v551_v19 = vadd.f32 %v1421_v3, %v550_v18  ;;  %v1514_v20 = vpop.f32.mrb[5].mxu1 }
 0x1ba   : > { %v553_v21 = vpop.f32.mrb[6].mxu1 }
 0x1bb   : > { %v556_v22 = vmul.f32 0.35355338, %v551_v19  ;;  %v1515_v23 = vpop.f32.mrb[7].mxu1 }
 0x1bc   : > { %v2132_v24 = vld [vmem:[#allocation2] sm:$0xf] }
 0x1bd   : > { %v2134_v25 = vld [vmem:[#allocation2] ss:$0 sps:$4 sm:$0xff]   ;;  %v557_v26 = vpack.c.bf16 %v556_v22, %v556_v22  ;;  %v564_v27 = vsel %vm559_vm3, %v2132_v24, 0  ;;  %v1430_v12 = vcombine.low %v2132_v24, %v2132_v24 }
 0x1be   : > { %1517 = vmatpush3.bf16.xpose.msra.mxu0 %v564_v27  ;;  %680 = vrot.lane.b32.xlu1 %v2134_v25, %s1868_s29  ;;  %v2140_v28 = vld [vmem:[#allocation2] ss:$0 sps:$4 sm:$0xff]  }
 0x1bf   : > { %675 = vrot.lane.b32.xlu0 %v557_v26, %s1868_s29  ;;  %1528 = vmatprep.subr.bf16.mxu0 %v1865_v0  ;;  %v2143_v29 = vld [vmem:[#allocation2] ss:$0 sps:$4 sm:$0xff]  }
 0x1c2   : > { %803 = vrot.lane.b32.xlu1 %v2140_v28, %s1869_s21 }
 0x1c3   : > { %798 = vrot.lane.b32.xlu0 %v557_v26, %s1869_s21  ;;  %s1419_s21 = sshll.u32 %s2077_s25, 3 }
 0x1c5   : > { %1519 = vmatmul.mubr.msk.bf16.vlgmr.msra.gmra.mrb[0].mxu0 %vm559_vm3, %v557_v26 }
 0x1c6   : > { %926 = vrot.lane.b32.xlu1 %v2143_v29, %s1870_s24  ;;  %1530 = vmatprep.mubr.msk.bf16.mxu0 %vm1866_vm0, %v1865_v0 }
 0x1c7   : > { %921 = vrot.lane.b32.xlu0 %v557_v26, %s1870_s24 }
 0x230   : > { %v681_v30 = vpop.permute.xlu1 %680 }
 0x231   : > { %v686_v31 = vsel %vm559_vm3, %v681_v30, 0  ;;  %v676_v33 = vpop.permute.xlu0 %675 }
 0x232   : > { %1529 = vmatpush3.bf16.xpose.msra.mxu0 %v686_v31 }
 0x233   : > { %1540 = vmatprep.subr.bf16.mxu0 %v1865_v0 }
 0x234   : > { %v804_v32 = vpop.permute.xlu1 %803 }
 0x235   : > { %v809_v34 = vsel %vm559_vm3, %v804_v32, 0  ;;  %v799_v36 = vpop.permute.xlu0 %798 }
 0x238   : > { %v927_v35 = vpop.permute.xlu1 %926 }
 0x239   : > { %1531 = vmatmul.mubr.msk.bf16.vlgmr.msra.gmra.mrb[4].mxu0 %vm559_vm3, %v676_v33  ;;  %v932_v37 = vsel %vm559_vm3, %v927_v35, 0  ;;  %v922_v38 = vpop.permute.xlu0 %921 }
 0x23a   : > { %1541 = vmatpush3.bf16.xpose.msra.mxu0 %v809_v34  ;;  %1542 = vmatprep.mubr.msk.bf16.mxu0 %vm1866_vm0, %v1865_v0 }
 0x23b   : > { %1552 = vmatprep.subr.bf16.mxu0 %v1865_v0 }
 0x241   : > { %1543 = vmatmul.mubr.msk.bf16.vlgmr.msra.gmra.mrb[8].mxu0 %vm559_vm3, %v799_v36 }
 0x242   : > { %1553 = vmatpush3.bf16.xpose.msra.mxu0 %v932_v37  ;;  %1554 = vmatprep.mubr.msk.bf16.mxu0 %vm1866_vm0, %v1865_v0 }
 0x243   : > { %1564 = vmatprep.subr.bf16.mxu0 %v1865_v0 }
 0x249   : > { %1555 = vmatmul.mubr.msk.bf16.vlgmr.msra.gmra.mrb[12].mxu0 %vm559_vm3, %v922_v38 }
 0x24a   : > { %1568 = vmatprep.mubr.msk.bf16.mxu0 %vm1866_vm0, %v1865_v0 }
 0x298   : > { %v600_v39 = vpop.f32.mrb[0].mxu0 }
 0x299   : > { %v1520_v40 = vpop.f32.mrb[1].mxu0  ;;  %v606_v41 = vsel %vm559_vm3, %v600_v39, -inf }
 0x29a   : > { %607 = vmax.xlane.f32.xlu1 %v606_v41  ;;  %v603_v42 = vpop.f32.mrb[2].mxu0 }
 0x29b   : > { %v1521_v43 = vpop.f32.mrb[3].mxu0 }
 0x30c   : > { %v722_v44 = vpop.f32.mrb[4].mxu0 }
 0x30d   : > { %v1532_v45 = vpop.f32.mrb[5].mxu0  ;;  %v728_v46 = vsel %vm559_vm3, %v722_v44, -inf }
 0x30e   : > { %729 = vmax.xlane.f32.xlu0 %v728_v46  ;;  %v725_v47 = vpop.f32.mrb[6].mxu0 }
 0x30f   : > { %v1533_v48 = vpop.f32.mrb[7].mxu0 }
 0x314   : > { %v845_v49 = vpop.f32.mrb[8].mxu0 }
 0x315   : > { %v1544_v50 = vpop.f32.mrb[9].mxu0  ;;  %v851_v51 = vsel %vm559_vm3, %v845_v49, -inf }
 0x316   : > { %852 = vmax.xlane.f32.xlu0 %v851_v51  ;;  %v848_v52 = vpop.f32.mrb[10].mxu0 }
 0x317   : > { %v1545_v53 = vpop.f32.mrb[11].mxu0  ;;  %v1687_v52 = vld [vmem:[%s2303_s4] sm:$0xff]  }
 0x318   : > { %1565 = vmatpush3.bf16.msra.mxu0 %v1687_v52 }
 0x319   : > { %1566 = vmatprep.subr.bf16.mxu0 %v1865_v0 }
 0x31c   : > { %v968_v54 = vpop.f32.mrb[12].mxu0 }
 0x31d   : > { %v1556_v55 = vpop.f32.mrb[13].mxu0  ;;  %v974_v56 = vsel %vm559_vm3, %v968_v54, -inf }
 0x31e   : > { %975 = vmax.xlane.f32.xlu1 %v974_v56  ;;  %v971_v57 = vpop.f32.mrb[14].mxu0 }
 0x31f   : > { %v1557_v58 = vpop.f32.mrb[15].mxu0 }
 0x327   : > { %v608_v59 = vpop.xlane.xlu1 %607 }
 0x328   : > { %v609_v60 = vsub.f32 %v600_v39, %v608_v59 }
 0x32a   : > { %v610_v61 = vmul.f32 1.442695, %v609_v60 }
 0x32c   : > { %1695 = vpow2.f32 %v610_v61 }
 0x336   : > { %v1696_v62 = vpop.eup %1695 }
 0x337   : > { %v612_v63 = vsel %vm559_vm3, %v1696_v62, 0.0 }
 0x338   : > { %613 = vadd.xlane.f32.xlu0 %v612_v63 }
 0x39b   : > { %v730_v1 = vpop.xlane.xlu0 %729 }
 0x39c   : > { %v731_v2 = vsub.f32 %v722_v44, %v730_v1 }
 0x39e   : > { %v732_v3 = vmul.f32 1.442695, %v731_v2 }
 0x3a0   : > { %1697 = vpow2.f32 %v732_v3 }
 0x3a3   : > { %v853_v4 = vpop.xlane.xlu0 %852 }
 0x3a4   : > { %v854_v5 = vsub.f32 %v845_v49, %v853_v4 }
 0x3a6   : > { %v855_v6 = vmul.f32 1.442695, %v854_v5  ;;  %v1444_v5 = vld [vmem:[%s2304_s5] ss:$0 sm:$0xff] }
 0x3a8   : > { %1699 = vpow2.f32 %v855_v6 }
 0x3aa   : > { %v1698_v7 = vpop.eup %1697 }
 0x3ab   : > { %v734_v8 = vsel %vm559_vm3, %v1698_v7, 0.0  ;;  %v976_v13 = vpop.xlane.xlu1 %975 }
 0x3ac   : > { %735 = vadd.xlane.f32.xlu1 %v734_v8  ;;  %v977_v14 = vsub.f32 %v968_v54, %v976_v13  ;;  %v1688_v54 = vld [vmem:[%s2303_s4 + $0x8] sm:$0xff]  }
 0x3ad   : > { %1567 = vmatpush3.bf16.msra.mxu0 %v1688_v54 }
 0x3ae   : > { %v978_v15 = vmul.f32 1.442695, %v977_v14  ;;  %1580 = vmatprep.subr.bf16.mxu0 %v1865_v0 }
 0x3b0   : > { %1701 = vpow2.f32 %v978_v15 }
 0x3b2   : > { %v1700_v10 = vpop.eup %1699 }
 0x3b3   : > { %v857_v11 = vsel %vm559_vm3, %v1700_v10, 0.0 }
 0x3b4   : > { %858 = vadd.xlane.f32.xlu0 %v857_v11 }
 0x3ba   : > { %v1702_v16 = vpop.eup %1701 }
 0x3bb   : > { %v980_v17 = vsel %vm559_vm3, %v1702_v16, 0.0 }
 0x3bd   : > { %740 = vrot.lane.b32.xlu1 %v2134_v25, %s1871_s20 }
 0x3c5   : > { %v614_v18 = vpop.xlane.xlu0 %613 }
 0x3c6   : > { %1703 = vrcp.f32 %v614_v18 }
 0x3ca   : > { %621 = vrot.lane.b32.xlu0 %v1430_v12, %s1867_s17  ;;  %s1874_s17 = smov 8  }
 0x3ce   : > { %986 = vrot.lane.b32.xlu0 %v2143_v29, %s1872_s23  ;;  %s1461_s23 = sshll.u32 %s1851_s12, 7  ;;  %s1291_s12 = scalar_lea.sflag [#allocation6], %s2077_s25 }
 0x3cf   : > { %s2249_s28 = scalar_lea.hbm %s2308_s9, %s1461_s23 }
 0x3d0   : > { %v1704_v20 = vpop.eup %1703 }
 0x3d1   : > { %v616_v22 = vmul.f32 %v1704_v20, %v1696_v62  ;;  %v1690_v20 = vld [vmem:[#allocation7 + $0x8] sm:$0xff]  }
 0x3d3   : > { %v617_v26 = vpack.c.bf16 %v616_v22, %v616_v22 }
 0x3e1   : > { %981 = vadd.xlane.f32.xlu1 %v980_v17 }
 0x3f2   : > { %863 = vrot.lane.b32.xlu1 %v2140_v28, %s1873_s18  ;;  %s397_s18 = scalar_lea.vmem [#allocation9], %s1419_s21 }
 0x439   : > { %v736_v19 = vpop.xlane.xlu1 %735 }
 0x43a   : > { %1705 = vrcp.f32 %v736_v19  ;;  %v1689_v19 = vld [vmem:[#allocation7] sm:$0xff]  }
 0x43d   : > { %v741_v25 = vpop.permute.xlu1 %740 }
 0x43e   : > { %v746_v29 = vsel %vm626_vm4, %v741_v25, 0 }
 0x441   : > { %v859_v21 = vpop.xlane.xlu0 %858 }
 0x442   : > { %1707 = vrcp.f32 %v859_v21 }
 0x444   : > { %v1706_v27 = vpop.eup %1705 }
 0x445   : > { %v622_v23 = vpop.permute.xlu0 %621  ;;  %v738_v28 = vmul.f32 %v1706_v27, %v1698_v7 }
 0x446   : > { %v628_v24 = vsel %vm626_vm4, %v622_v23, 0 }
 0x447   : > { %1523 = vmatpush3.bf16.msra.mxu1 %v628_v24  ;;  %v739_v30 = vpack.c.bf16 %v738_v28, %v738_v28  ;;  %v1448_v24 = vld [vmem:[%s2304_s5 + $0x1] ss:$0 sm:$0xff] }
 0x448   : > { %1534 = vmatprep.subr.bf16.mxu1 %v1865_v0 }
 0x449   : > { %v987_v36 = vpop.permute.xlu0 %986 }
 0x44a   : > { %1525 = vmatmul.mubr.msk.bf16.vlgmr.msra.gmra.mrb[8].mxu1 %vm559_vm3, %v617_v26  ;;  %v992_v38 = vsel %vm626_vm4, %v987_v36, 0  ;;  %v1449_v26 = vld [vmem:[%s2304_s5 + $0x2] ss:$0 sm:$0xff] }
 0x44b   : > { %1535 = vmatpush3.bf16.msra.mxu1 %v746_v29  ;;  %1536 = vmatprep.mubr.msk.bf16.mxu1 %vm1866_vm0, %v1865_v0 }
 0x44c   : > { %1546 = vmatprep.subr.bf16.mxu1 %v1865_v0  ;;  %v1708_v31 = vpop.eup %1707 }
 0x44d   : > { %v861_v33 = vmul.f32 %v1708_v31, %v1700_v10  ;;  %v1692_v31 = vld [vmem:[%s2307_s8 + $0x8] sm:$0xff]  }
 0x44f   : > { %v862_v37 = vpack.c.bf16 %v861_v33, %v861_v33  ;;  %v1694_v33 = vld [vmem:[%s2307_s8 + $0x18] sm:$0xff]  }
 0x452   : > { %1537 = vmatmul.mubr.msk.bf16.vlgmr.msra.gmra.mrb[12].mxu1 %vm559_vm3, %v739_v30  ;;  %v1691_v30 = vld [vmem:[%s2307_s8] sm:$0xff]  }
 0x453   : > { %1548 = vmatprep.mubr.msk.bf16.mxu1 %vm1866_vm0, %v1865_v0 }
 0x46e   : > { %v982_v32 = vpop.xlane.xlu1 %981 }
 0x46f   : > { %1709 = vrcp.f32 %v982_v32  ;;  %v1693_v32 = vld [vmem:[%s2307_s8 + $0x10] sm:$0xff]  }
 0x472   : > { %v864_v34 = vpop.permute.xlu1 %863 }
 0x473   : > { %v869_v35 = vsel %vm626_vm4, %v864_v34, 0  ;;  %v1450_v34 = vld [vmem:[%s2306_s7] ss:$0 sm:$0xff] }
 0x474   : > { %1547 = vmatpush3.bf16.msra.mxu1 %v869_v35 }
 0x475   : > { %1558 = vmatprep.subr.bf16.mxu1 %v1865_v0 }
 0x477   : > { %1549 = vmatmul.mubr.msk.bf16.vlgmr.msra.gmra.mrb[16].mxu1 %vm559_vm3, %v862_v37 }
 0x478   : > { %1559 = vmatpush3.bf16.msra.mxu1 %v992_v38  ;;  %1560 = vmatprep.mubr.msk.bf16.mxu1 %vm1866_vm0, %v1865_v0 }
 0x479   : > { %v1710_v39 = vpop.eup %1709  ;;  %1572 = vmatprep.subr.bf16.mxu1 %v1865_v0 }
 0x47a   : > { %v984_v40 = vmul.f32 %v1710_v39, %v1702_v16 }
 0x47c   : > { %v985_v41 = vpack.c.bf16 %v984_v40, %v984_v40 }
 0x47f   : > { %1561 = vmatmul.mubr.msk.bf16.vlgmr.msra.gmra.mrb[20].mxu1 %vm559_vm3, %v985_v41 }
 0x480   : > { %1576 = vmatprep.mubr.msk.bf16.mxu1 %vm1866_vm0, %v1865_v0  ;;  %1573 = vmatpush3.bf16.msra.mxu1 %v1689_v19 }
 0x481   : > { %1574 = vmatprep.subr.bf16.mxu1 %v1865_v0 }
 0x484   : > { %1575 = vmatpush3.bf16.msra.mxu1 %v1690_v20 }
 0x51d   : > { %v664_v42 = vpop.f32.mrb[8].mxu1 }
 0x51e   : > { %v670_v43 = vpack.c.bf16 %v664_v42, %v664_v42  ;;  %v1526_v44 = vpop.f32.mrb[9].mxu1 }
 0x51f   : > { %v667_v45 = vpop.f32.mrb[10].mxu1 }
 0x520   : > { %672 = vst.msk [vmem:[#allocation3] sm:$0xf] %vm671_vm5, %v670_v43  ;;  %v1527_v46 = vpop.f32.mrb[11].mxu1  ;;  %v1454_v45 = vld [vmem:[%s2304_s5 + $0x3] ss:$0 sm:$0xff] }
 0x525   : > { %v782_v47 = vpop.f32.mrb[12].mxu1 }
 0x526   : > { %v1464_v48 = vpack.c.bf16 %v782_v47, %v782_v47  ;;  %v1538_v49 = vpop.f32.mrb[13].mxu1 }
 0x527   : > { %v785_v50 = vpop.f32.mrb[14].mxu1 }
 0x528   : > { %792 = vrot.lane.b32.xlu1 %v1464_v48, %s1874_s17  ;;  %v1539_v51 = vpop.f32.mrb[15].mxu1  ;;  %s1305_s17 = sshll.u32 %s397_s18, 4  ;;  %s2251_s17 = int_to_ptr.vmem [resolvable:$true] %s1305_s17 }
 0x529   : > { %s1773_s15 = scalar_lea.vmem %s2251_s17, 128 }
 0x52a   : > { %p1774_p6 = scmp.ne.s32.totalorder %s2251_s17, %s1773_s15 }
 0x52c   : > { %p1775_p8 = pnand %p1774_p6, %p2024_p10 }
 0x52e   : > { %p1776_p12 = pneg %p1775_p8 }
 0x54a   : > { %v905_v53 = vpop.f32.mrb[16].mxu1 }
 0x54b   : > { %v1465_v55 = vpack.c.bf16 %v905_v53, %v905_v53  ;;  %v1550_v56 = vpop.f32.mrb[17].mxu1 }
 0x54c   : > { %v908_v57 = vpop.f32.mrb[18].mxu1 }
 0x54d   : > { %915 = vrot.lane.b32.xlu0 %v1465_v55, %s1875_s6  ;;  %v1551_v58 = vpop.f32.mrb[19].mxu1  ;;  %s1877_s6 = smov [#allocation9]  }
 0x552   : > { %v1028_v59 = vpop.f32.mrb[20].mxu1 }
 0x553   : > { %v1466_v60 = vpack.c.bf16 %v1028_v59, %v1028_v59  ;;  %v1562_v61 = vpop.f32.mrb[21].mxu1 }
 0x554   : > { %v1031_v62 = vpop.f32.mrb[22].mxu1 }
 0x555   : > { %1038 = vrot.lane.b32.xlu1 %v1466_v60, %s1876_s30  ;;  %v1563_v63 = vpop.f32.mrb[23].mxu1  ;;  %s1777_s30 = sshll.u32 %s1877_s6, 4  ;;  %s1778_s30 = int_to_ptr.vmem [resolvable:$false] %s1777_s30 }
 0x556   : > { %s1779_s19 = scalar_lea.vmem %s1778_s30, 256  ;;  %p1780_p11 = scmp.lt.s32.totalorder %s2251_s17, %s1778_s30 }
 0x557   : > { %p1781_p0 = scmp.lt.s32.totalorder %s1779_s19, %s1773_s15 }
 0x559   : > { %p1782_p5 = por %p1781_p0, %p1780_p11 }
 0x55b   : > { %p1783_p9 = pnand %p1782_p5, %p1776_p12 }
 0x59a   : > { %v793_v1 = vpop.permute.xlu1 %792 }
 0x59b   : > { %796 = vst.msk [vmem:[#allocation3] sm:$0xf] %vm795_vm6, %v793_v1 }
 0x5bf   : > { %v916_v2 = vpop.permute.xlu0 %915 }
 0x5c0   : > { %919 = vst.msk [vmem:[#allocation3] sm:$0xf] %vm918_vm7, %v916_v2 }
 0x5c7   : > { %v1039_v3 = vpop.permute.xlu1 %1038 }
 0x5c8   : > { %1042 = vst.msk [vmem:[#allocation3] sm:$0xf] %vm1041_vm8, %v1039_v3 }
 0x5cf   : > { %v1047_v4 = vld [vmem:[#allocation3] sm:$0xf] }
 0x5d0   : > { %1569 = vmatmul.mubr.msk.bf16.vlgmr.msra.gmra.mrb[16].mxu0 %vm440_vm1, %v1047_v4 }
 0x5d1   : > { %1588 = vmatprep.mubr.msk.bf16.mxu0 %vm1866_vm0, %v1865_v0  ;;  %1581 = vmatpush3.bf16.msra.mxu0 %v1691_v30 }
 0x5d2   : > { %1582 = vmatprep.subr.bf16.mxu0 %v1865_v0 }
 0x5d5   : > { %1583 = vmatpush3.bf16.msra.mxu0 %v1692_v31 }
 0x5d6   : > { %1584 = vmatprep.subr.bf16.mxu0 %v1865_v0 }
 0x5d9   : > { %1585 = vmatpush3.bf16.msra.mxu0 %v1693_v32 }
 0x5da   : > { %1586 = vmatprep.subr.bf16.mxu0 %v1865_v0 }
 0x5dd   : > { %1587 = vmatpush3.bf16.msra.mxu0 %v1694_v33 }
 0x6a3   : > { %v1105_v6 = vpop.f32.mrb[16].mxu0 }
 0x6a4   : > { %v1106_v7 = vadd.f32 %v1444_v5, %v1105_v6  ;;  %v1570_v8 = vpop.f32.mrb[17].mxu0 }
 0x6a5   : > { %v1108_v10 = vpop.f32.mrb[18].mxu0 }
 0x6a6   : > { %v1571_v11 = vpop.f32.mrb[19].mxu0  ;;  %v1111_v12 = vadd.f32 %v1106_v7, %v2123_v9 }
 0x6a8   : > { %v1112_v13 = vsel %vm440_vm1, %v1111_v12, 0.0 }
 0x6a9   : > { %1113 = vadd.xlane.f32.xlu0 %v1112_v13 }
 0x736   : > { %v1114_v14 = vpop.xlane.xlu0 %1113 }
 0x737   : > { %v1116_v15 = vmul.f32 0.03125, %v1114_v14 }
 0x739   : > { %v1117_v16 = vsub.f32 %v1111_v12, %v1116_v15 }
 0x73b   : > { %v1118_v17 = vmul.f32 %v1117_v16, %v1117_v16 }
 0x73d   : > { %v1119_v18 = vsel %vm440_vm1, %v1118_v17, 0.0 }
 0x73e   : > { %1120 = vadd.xlane.f32.xlu1 %v1119_v18 }
 0x7cb   : > { %v1121_v21 = vpop.xlane.xlu1 %1120 }
 0x7cc   : > { %v1122_v22 = vmul.f32 0.03125, %v1121_v21 }
 0x7ce   : > { %v1123_v23 = vadd.f32 1e-05, %v1122_v22 }
 0x7d0   : > { %1711 = vrsqrt.f32 %v1123_v23 }
 0x7da   : > { %v1712_v9 = vpop.eup %1711 }
 0x7db   : > { %v1125_v25 = vmul.f32 %v1712_v9, %v1117_v16 }
 0x7dd   : > { %v1130_v27 = vmul.f32 %v1448_v24, %v1125_v25 }
 0x7df   : > { %v1135_v29 = vadd.f32 %v1449_v26, %v1130_v27 }
 0x7e1   : > { %v1136_v28 = vpack.c.bf16 %v1135_v29, %v1135_v29 }
 0x7e3   : > { %1577 = vmatmul.mubr.msk.bf16.vlgmr.msra.gmra.mrb[24].mxu1 %vm440_vm1, %v1136_v28 }
 0x8b6   : > { %v1197_v35 = vpop.f32.mrb[24].mxu1 }
 0x8b7   : > { %v1198_v36 = vadd.f32 %v1450_v34, %v1197_v35  ;;  %v1578_v37 = vpop.f32.mrb[25].mxu1 }
 0x8b8   : > { %v1200_v38 = vpop.f32.mrb[26].mxu1 }
 0x8b9   : > { %v1204_v39 = vmul.f32 0.70710677, %v1198_v36  ;;  %v1579_v40 = vpop.f32.mrb[27].mxu1  ;;  %v1203_v0 = vmul.f32 0.5, %v1198_v36 }
 0x8bb   : > { %1713 = verf.f32 %v1204_v39 }
 0x8c5   : > { %v1714_v41 = vpop.eup %1713 }
 0x8c6   : > { %v1206_v42 = vadd.f32 1.0, %v1714_v41 }
 0x8c8   : > { %v1207_v43 = vmul.f32 %v1206_v42, %v1203_v0 }
 0x8ca   : > { %v1208_v44 = vpack.c.bf16 %v1207_v43, %v1207_v43 }
 0x8cc   : > { %1589 = vmatmul.mubr.msk.bf16.vlgmr.msra.gmra.mrb[20].mxu0 %vm1245_vm9, %v1208_v44 }
 0x99f   : > { %v1283_v46 = vpop.f32.mrb[20].mxu0 }
 0x9a0   : > { %v1284_v47 = vadd.f32 %v1454_v45, %v1283_v46  ;;  %v1590_v48 = vpop.f32.mrb[21].mxu0 }
 0x9a1   : > { %v1286_v49 = vpop.f32.mrb[22].mxu0 }
 0x9a2   : > { %v1591_v50 = vpop.f32.mrb[23].mxu0  ;;  %1289 = vst.msk [vmem:[%s397_s18] sm:$0xff] %vm440_vm1, %v1284_v47 }
 0x9a3   : > { %1786 = shalt.err (!%p1783_p9)
}
 0x9a4   : > { %s1787_s25 = scalar_lea.hbm %s2249_s28, 128  ;;  %s1791_s24 = scalar_lea.hbm %s2308_s9, 256 }
 0x9a5   : > { %p1788_p1 = scmp.ne.s32.totalorder %s2249_s28, %s1787_s25  ;;  %p1792_p3 = scmp.lt.u32.totalorder %s2249_s28, %s2308_s9 }
 0x9a6   : > { %p1793_p4 = scmp.lt.u32.totalorder %s1791_s24, %s1787_s25  ;;  %p1795_p6 = scmp.lt.u32.totalorder %s1787_s25, %s2249_s28 }
 0x9a7   : > { %p1789_p2 = pnand %p1788_p1, %p2024_p10 }
 0x9a8   : > { %p1794_p13 = por %p1793_p4, %p1792_p3 }
 0x9a9   : > { %p1790_p7 = pneg %p1789_p2 }
 0x9aa   : > { %p1796_p8 = por %p1795_p6, %p1794_p13 }
 0x9ac   : > { %p1797_p12 = pnand %p1796_p8, %p1790_p7 }
 0x9ae   : > { %1800 = shalt.err (!%p1797_p12)
}
 0x9af   : > { %1598 = dma.vmem_to_hbm [thread:$0]  (%p2024_p10), %s2251_s17, 128, %s2249_s28, %s1291_s12  }
 0x9b0 PF: > { %s2334_s18 = sld [smem:[#allocation13_spill]]  ;;  %s2335_s22 = sld [smem:[#allocation14_spill]] }
 0x9b1   : > { %p2337_p0 = scmp.ge.s32.totalorder %s1859_s14, 2 }
 0x9b6   : > { %s1317_s27 = sand.u32 1, %s2334_s18   ;;  %p2336_p11 = scmp.ne.s32.totalorder %s2335_s22, 0 }
 0x9b7   : > { %s1318_s15 = scalar_lea.sflag [#allocation6], %s1317_s27 }
 0x9b8   : > { %p1609_p5 = pnand %p2337_p0, %p2336_p11 }
 0x9ba   : > { %1834 = dma.done.wait (!%p1609_p5), %s1318_s15, 128  }
 0x9bb   : > { %1836 = vsyncadd (!%p1609_p5), %s1318_s15, 4294967168  ;;  %s26_s14 = sadd.s32 1, %s1859_s14   ;;  %s2338_s16 = sld [smem:[#allocation15_spill]] }
 0x9bc   : > { %p23_p9 = scmp.ge.s32.totalorder %s26_s14, 4   ;;  %s2339_s30 = smov %s1843_s10 }
 0x9bd   : > { %s2340_s10 = smov %s1847_s11  ;;  %s2341_s11 = smov %s2033_s26 }
 0x9be   : > { %s2342_s12 = smov %s1855_s13  ;;  %25 = sbr.rel (!%p23_p9) target bundleno = 9 (0x9), region = 112 }
 0x9c1   : > { %s2343_s13 = smov %s2338_s16 }
 0x9c5   :  { %1323 = vsyncpa [#allocation5], 1 }
 0x9c6   :  { %1325 = vsyncpa [#allocation5 + $0x1], 1 }
 0x9c7   :  { %1326 = vsyncpa [#allocation8], 1 }
 0x9c8   :  { %1327 = vsyncpa [#allocation6], 1 }
 0x9c9   :  { %1329 = vsyncpa [#allocation6 + $0x1], 1 }

</bundles_post_ra>
